<compile_context>
chip_gen: v7x
topology: tpu7x:2x2x1
jax: 0.10.0
libtpu: 0.0.40
codegen_flags: <defaults>
</compile_context>

<pallas_src>
import functools
import math

import jax
import jax.numpy as jnp
import numpy as np
from jax.experimental import pallas as pl
from jax.experimental.pallas import tpu as pltpu

# Plain Python float: Pallas kernels must not close over jax-array constants.
NEG_BIG = -1e30


def _round_up(x, m):
    return ((x + m - 1) // m) * m


def _qkv_proj_kernel(h_ref, w_ref, b_ref, o_ref):
    """Fused (TS, E) @ (E, 3E) + bias projection tile (bf16 inputs, f32 MXU accumulation)."""
    acc = jnp.dot(h_ref[...], w_ref[...], preferred_element_type=jnp.float32)
    o_ref[...] = (acc + b_ref[...]).astype(o_ref.dtype)


def _banded_attn_kernel(q_ref, k_ref, v_ref, kmask_ref, o_ref, *,
                        seq_len, q_tile, band, window, heads_per_block, head_dim):
    """One grid step == (head_group, q_tile); only the key band around the q-tile is touched."""
    qi = pl.program_id(1)

    # Band slice start: aligned down to 8 sublanes, clamped into [0, seq_len - band].
    # (identical formula is used in the wrapper to pre-slice the additive key mask)
    start = jnp.maximum(qi * q_tile - window, 0)
    start = (start // 8) * 8
    start = jnp.minimum(start, seq_len - band)

    # Per-tile additive bias shared by every head in the group:
    #   inside the +/- window  -> additive key mask (0 or -10000, the HF diagonal mask)
    #   outside the window     -> -1e30  (== _mask_invalid_locations' -inf)
    q_pos = qi * q_tile + jax.lax.broadcasted_iota(jnp.int32, (q_tile, band), 0)
    k_pos = start + jax.lax.broadcasted_iota(jnp.int32, (q_tile, band), 1)
    in_band = jnp.abs(q_pos - k_pos) <= window
    bias = jnp.where(in_band, kmask_ref[...], NEG_BIG)            # (q_tile, band) f32

    outs = []
    for g in range(heads_per_block):                              # static unroll over heads
        q = q_ref[g]                                              # (q_tile, head_dim)  bf16
        k = k_ref[g, pl.ds(start, band), :]                       # (band, head_dim)    bf16
        v = v_ref[g, pl.ds(start, band), :]                       # (band, head_dim)    bf16

        # q @ k^T via dot_general contracting the last dims (no explicit k transpose).
        s = jax.lax.dot_general(q, k, (((1,), (1,)), ((), ())),
                                preferred_element_type=jnp.float32)   # (q_tile, band) f32
        s = s + bias

        # softmax over the key band, in f32.
        m = jnp.max(s, axis=-1, keepdims=True)
        p = jnp.exp(s - m)
        denom = jnp.sum(p, axis=-1, keepdims=True)
        p = p * pl.reciprocal(denom, approx=True)

        # probs @ V (bf16 MXU inputs, f32 accumulation)
        outs.append(jax.lax.dot_general(p.astype(v.dtype), v, (((1,), (0,)), ((), ())),
                                        preferred_element_type=jnp.float32))

    # One lane-dense store of the whole (q_tile, heads_per_block*head_dim) output tile.
    o_ref[...] = jnp.concatenate(outs, axis=-1).astype(o_ref.dtype)


def randomized_longformer_self_attention(hidden_states, Wq, bq, Wk, bk, Wv, bv,
                                         attention_mask, is_index_masked,
                                         *, num_heads, head_dim, window,
                                         q_tile=None, heads_per_block=None,
                                         seq_tile=None, matmul_dtype=jnp.bfloat16):
    """hidden_states: (1, S, E). Returns the attention output of shape (1, S, E) (f32)."""
    B, S, E = hidden_states.shape
    assert B == 1, "randomized path squeezes the batch dim (batch_size must be 1)"
    assert E == num_heads * head_dim

    # ---- tiling parameters --------------------------------------------------
    if heads_per_block is None:                      # aim for >=128-lane output stores
        heads_per_block = max(1, min(num_heads, 128 // max(head_dim, 1)))
    heads_per_block = max(1, min(heads_per_block, num_heads))
    while num_heads % heads_per_block:
        heads_per_block -= 1
    G = heads_per_block
    HG = num_heads // G

    if q_tile is None:
        q_tile = min(S, 512)
    TQ = q_tile if (S % q_tile == 0 and q_tile % 8 == 0) else S
    QT = S // TQ

    if TQ % 8 == 0 and window % 8 == 0:
        BAND = min(S, TQ + 2 * window)
    else:
        BAND = min(S, _round_up(TQ + 2 * window + 7, 8))

    if seq_tile is None:
        seq_tile = min(S, 512)
    TS = seq_tile if (S % seq_tile == 0 and seq_tile % 8 == 0) else S

    # ---- stage 1: fused lane-dense QKV projection (q-scaling folded into Wq / bq) ----
    inv_scale = 1.0 / math.sqrt(head_dim)
    hs = hidden_states[0].astype(matmul_dtype)                                          # (S, E)
    w_qkv = jnp.concatenate([Wq.T * inv_scale, Wk.T, Wv.T], axis=1).astype(matmul_dtype)  # (E, 3E)
    b_qkv = jnp.concatenate([bq * inv_scale, bk, bv]).reshape(1, 3 * E).astype(jnp.float32)

    proj_cost = pl.CostEstimate(
        flops=2 * S * E * 3 * E,
        transcendentals=0,
        bytes_accessed=int(hs.size * hs.dtype.itemsize + w_qkv.size * w_qkv.dtype.itemsize
                           + b_qkv.size * 4 + S * 3 * E * hs.dtype.itemsize))

    qkv = pl.pallas_call(
        _qkv_proj_kernel,
        out_shape=jax.ShapeDtypeStruct((S, 3 * E), matmul_dtype),
        grid_spec=pltpu.PrefetchScalarGridSpec(
            num_scalar_prefetch=0,
            grid=(S // TS,),
            in_specs=[
                pl.BlockSpec((TS, E), lambda i: (i, 0)),
                pl.BlockSpec((E, 3 * E), lambda i: (0, 0)),
                pl.BlockSpec((1, 3 * E), lambda i: (0, 0)),
            ],
            out_specs=pl.BlockSpec((TS, 3 * E), lambda i: (i, 0)),
        ),
        compiler_params=pltpu.CompilerParams(
            dimension_semantics=("parallel",),
            vmem_limit_bytes=48 * 1024 * 1024),
        cost_estimate=proj_cost,
    )(hs, w_qkv, b_qkv)

    # split + regroup heads: (S, E) -> (HG, G, S, HD)   (layout plumbing in XLA)
    def to_groups(x):
        return jnp.transpose(x.reshape(S, HG, G, head_dim), (1, 2, 0, 3))

    q_g = to_groups(qkv[:, :E])
    k_g = to_groups(qkv[:, E:2 * E])
    v_g = to_groups(qkv[:, 2 * E:])

    # Per-q-tile additive key mask, pre-sliced to the key band (tiny: QT x BAND f32).
    kmask = jnp.where(attention_mask[0] != 0, -10000.0, 0.0).astype(jnp.float32)        # (S,)
    starts = jnp.maximum(jnp.arange(QT, dtype=jnp.int32) * TQ - window, 0)
    starts = (starts // 8) * 8
    starts = jnp.minimum(starts, S - BAND)
    band_idx = starts[:, None] + jnp.arange(BAND, dtype=jnp.int32)[None, :]
    kmask_tiles = kmask[band_idx][:, None, :]                                            # (QT, 1, BAND)

    kernel = functools.partial(
        _banded_attn_kernel, seq_len=S, q_tile=TQ, band=BAND, window=window,
        heads_per_block=G, head_dim=head_dim)

    attn_cost = pl.CostEstimate(
        flops=4 * num_heads * S * BAND * head_dim,             # q@k^T + p@v over the band
        transcendentals=num_heads * S * BAND,                  # exp
        bytes_accessed=int(3 * S * E * q_g.dtype.itemsize + QT * BAND * 4 + S * E * 4))

    out_g = pl.pallas_call(
        kernel,
        out_shape=jax.ShapeDtypeStruct((HG, S, G * head_dim), jnp.float32),
        grid_spec=pltpu.PrefetchScalarGridSpec(
            num_scalar_prefetch=0,
            grid=(HG, QT),
            in_specs=[
                pl.BlockSpec((None, G, TQ, head_dim), lambda hg, qi: (hg, 0, qi, 0)),   # q tile
                pl.BlockSpec((None, G, S, head_dim), lambda hg, qi: (hg, 0, 0, 0)),     # K per group
                pl.BlockSpec((None, G, S, head_dim), lambda hg, qi: (hg, 0, 0, 0)),     # V per group
                pl.BlockSpec((None, 1, BAND), lambda hg, qi: (qi, 0, 0)),               # key-mask band
            ],
            out_specs=pl.BlockSpec((None, TQ, G * head_dim), lambda hg, qi: (hg, qi, 0)),
        ),
        compiler_params=pltpu.CompilerParams(
            dimension_semantics=("parallel", "parallel"),
            vmem_limit_bytes=48 * 1024 * 1024),
        cost_estimate=attn_cost,
    )(q_g, k_g, v_g, kmask_tiles)

    # (HG, S, G*HD) -> (1, S, E)  == the module's attn_output.transpose(0, 1)
    out = jnp.transpose(out_g.reshape(HG, S, G, head_dim), (1, 0, 2, 3)).reshape(1, S, E)

    # masked_fill(attn_probs, is_index_masked[:, :, None, None], 0.0)  ==> masked query rows -> 0.
    keep = 1.0 - is_index_masked[0].astype(out.dtype)
    return out * keep[None, :, None]


def _reference_forward(x, Wq, bq, Wk, bk, Wv, bv, attention_mask, is_index_masked,
                       num_heads, head_dim, window, matmul_dtype=jnp.bfloat16):
    """Pure-JAX reference of the same forward semantics (mirrors the kernel's bf16 matmul casts)."""
    B, S, E = x.shape
    hs = x[0].astype(matmul_dtype)
    inv_scale = 1.0 / math.sqrt(head_dim)

    def proj(W, b, scale):
        y = jnp.dot(hs, (W.T * scale).astype(matmul_dtype),
                    preferred_element_type=jnp.float32) + b * scale
        return y.astype(matmul_dtype)

    q = proj(Wq, bq, inv_scale).reshape(S, num_heads, head_dim)
    k = proj(Wk, bk, 1.0).reshape(S, num_heads, head_dim)
    v = proj(Wv, bv, 1.0).reshape(S, num_heads, head_dim)

    scores = jnp.einsum('ihd,jhd->hij', q, k, preferred_element_type=jnp.float32)
    idx = jnp.arange(S)
    band = jnp.abs(idx[:, None] - idx[None, :]) <= window
    kmask = jnp.where(attention_mask[0] != 0, -10000.0, 0.0)
    scores = jnp.where(band[None], scores + kmask[None, None, :], NEG_BIG)
    p = jax.nn.softmax(scores, axis=-1)
    p = jnp.where(is_index_masked[0][None, :, None], 0.0, p)
    out = jnp.einsum('hij,jhd->ihd', p.astype(matmul_dtype), v,
                     preferred_element_type=jnp.float32)
    return out.reshape(1, S, E)


if __name__ == "__main__":
    B, S, E, H = 1, 32, 32, 4
    HD = E // H          # 8
    W = 4                # one_sided_attn_window_size; S (32) is a multiple of 2*W (8)

    key = jax.random.PRNGKey(0)
    k_x, k_wq, k_bq, k_wk, k_bk, k_wv, k_bv = jax.random.split(key, 7)

    x = jax.random.normal(k_x, (B, S, E), dtype=jnp.float32)
    scale = 1.0 / math.sqrt(E)
    Wq = jax.random.normal(k_wq, (E, E), dtype=jnp.float32) * scale
    bq = jax.random.normal(k_bq, (E,), dtype=jnp.float32) * scale
    Wk = jax.random.normal(k_wk, (E, E), dtype=jnp.float32) * scale
    bk = jax.random.normal(k_bk, (E,), dtype=jnp.float32) * scale
    Wv = jax.random.normal(k_wv, (E, E), dtype=jnp.float32) * scale
    bv = jax.random.normal(k_bv, (E,), dtype=jnp.float32) * scale

    # attention_mask semantics: 0 = local attention, -10000 = no attention
    attention_mask = jnp.zeros((B, S), dtype=jnp.float32).at[:, -3:].set(-10000.0)
    is_index_masked = attention_mask < 0

    out = randomized_longformer_self_attention(
        x, Wq, bq, Wk, bk, Wv, bv, attention_mask, is_index_masked,
        num_heads=H, head_dim=HD, window=W, q_tile=8)   # q_tile=8 -> exercises 4 banded q-tiles
    out = jax.block_until_ready(out)

    ref = _reference_forward(x, Wq, bq, Wk, bk, Wv, bv, attention_mask, is_index_masked,
                             H, HD, W)
    np.testing.assert_allclose(np.asarray(out), np.asarray(ref), rtol=3e-2, atol=3e-2)

    print("KERNEL_OK")
</pallas_src>

<mosaic_0001>
module attributes {stable_mosaic.version = 11 : i64} {
  func.func @_qkv_proj_kernel(%arg0: i32, %arg1: memref<32x32xbf16, #tpu.memory_space<vmem>>, %arg2: memref<32x96xbf16, #tpu.memory_space<vmem>>, %arg3: memref<1x96xf32, #tpu.memory_space<vmem>>, %arg4: memref<32x96xbf16, #tpu.memory_space<vmem>>) attributes {dimension_semantics = [#tpu.dimension_semantics<parallel>], iteration_bounds = array<i64: 1>, scalar_prefetch = 0 : i64, scratch_operands = 0 : i64, tpu.core_type = #tpu.core_type<tc>, window_params = [{transform_indices = @transform_0, window_bounds = array<i64: 32, 32>}, {pipeline_mode = #tpu.pipeline_mode<synchronous>, transform_indices = @transform_1, window_bounds = array<i64: 32, 96>}, {pipeline_mode = #tpu.pipeline_mode<synchronous>, transform_indices = @transform_2, window_bounds = array<i64: 1, 96>}, {transform_indices = @transform_3, window_bounds = array<i64: 32, 96>}]} {
    %c0 = arith.constant 0 : index
    %c0_0 = arith.constant 0 : index
    %0 = vector.load %arg1[%c0, %c0_0] : memref<32x32xbf16, #tpu.memory_space<vmem>>, vector<32x32xbf16>
    %c0_1 = arith.constant 0 : index
    %c0_2 = arith.constant 0 : index
    %1 = vector.load %arg2[%c0_1, %c0_2] : memref<32x96xbf16, #tpu.memory_space<vmem>>, vector<32x96xbf16>
    %cst = arith.constant dense<0.000000e+00> : vector<32x96xf32>
    %2 = tpu.matmul %0, %1, %cst {dimension_numbers = #tpu.dot_dimension_numbers<[1], [0], [0], [1], [0, 0, 1, 1], [], []>} : vector<32x32xbf16>, vector<32x96xbf16>, vector<32x96xf32> -> vector<32x96xf32>
    %c0_3 = arith.constant 0 : index
    %c0_4 = arith.constant 0 : index
    %3 = vector.load %arg3[%c0_3, %c0_4] : memref<1x96xf32, #tpu.memory_space<vmem>>, vector<1x96xf32>
    %4 = vector.broadcast %3 : vector<1x96xf32> to vector<32x96xf32>
    %5 = arith.addf %2, %4 : vector<32x96xf32>
    %6 = arith.truncf %5 : vector<32x96xf32> to vector<32x96xbf16>
    %c0_5 = arith.constant 0 : index
    %c0_6 = arith.constant 0 : index
    %7 = vector.load %arg4[%c0_5, %c0_6] : memref<32x96xbf16, #tpu.memory_space<vmem>>, vector<32x96xbf16>
    tpu.vector_store %arg4[%c0_5, %c0_6], %6 {strides = array<i32>} : memref<32x96xbf16, #tpu.memory_space<vmem>>, vector<32x96xbf16>,
    return
  }
  func.func @transform_0(%arg0: i32) -> (i32, i32) {
    %c0_i32 = arith.constant 0 : i32
    %c0_i32_0 = arith.constant 0 : i32
    return %arg0, %c0_i32 : i32, i32
  }
  func.func @transform_1(%arg0: i32) -> (i32, i32) {
    %c0_i32 = arith.constant 0 : i32
    %c0_i32_0 = arith.constant 0 : i32
    %c0_i32_1 = arith.constant 0 : i32
    return %c0_i32, %c0_i32_0 : i32, i32
  }
  func.func @transform_2(%arg0: i32) -> (i32, i32) {
    %c0_i32 = arith.constant 0 : i32
    %c0_i32_0 = arith.constant 0 : i32
    %c0_i32_1 = arith.constant 0 : i32
    return %c0_i32, %c0_i32_0 : i32, i32
  }
  func.func @transform_3(%arg0: i32) -> (i32, i32) {
    %c0_i32 = arith.constant 0 : i32
    %c0_i32_0 = arith.constant 0 : i32
    return %arg0, %c0_i32 : i32, i32
  }
}

</mosaic_0001>

<bundles_post_ra>
// kernel: tpu_custom_call.1
= control target key start
LH: loop header
LB: loop body
LE: loop exit
PB: predicated region body
PF: predicated region fallthrough
CT: control target
= control target key end

     0   :  { %8 = vsyncpa [#allocation3], 0  ;;  %s361_s0 = inlined_call_operand.hbm [shape: bf16[32,32], index: 0, kind: input, shape index: {}]   ;;  %s362_s1 = inlined_call_operand.hbm [shape: bf16[32,96], index: 1, kind: input, shape index: {}]   ;;  %s363_s2 = inlined_call_operand.vmem [shape: f32[1,96], index: 2, kind: input, shape index: {}]   ;;  %s364_s3 = inlined_call_operand.hbm [shape: bf16[32,96], index: 3, kind: output, shape index: {}]  }
   0x1   :  { %9 = vsyncpa [#allocation6], 0 }
   0x2   :  { %10 = vsyncpa [#allocation4], 0  ;;  %s284_s12 = smov [#allocation2]   ;;  %s212_s16 = scalar_lea.hbm %s361_s0, 256 }
   0x3   :  { %s16_s13 = sshll.u32 %s284_s12, 4  ;;  %p213_p0 = scmp.ne.s32.totalorder %s361_s0, %s212_s16  ;;  %s17_s13 = int_to_ptr.vmem [resolvable:$true] %s16_s13 }
   0x4   :  { %p216_p1 = scmp.lt.u32.totalorder %s212_s16, %s361_s0 }
   0x6   :  { %p218_p2 = pnand %p216_p1, %p213_p0 }
   0x8   :  { %221 = shalt.err (!%p218_p2)
}
   0x9   :  { %s222_s21 = scalar_lea.vmem %s17_s13, 256  ;;  %p227_p4 = scmp.lt.s32.totalorder %s17_s13, %s17_s13 }
   0xa   :  { %p223_p3 = scmp.ne.s32.totalorder %s17_s13, %s222_s21  ;;  %p228_p5 = scmp.lt.s32.totalorder %s222_s21, %s222_s21 }
   0xc   :  { %p229_p6 = por %p228_p5, %p227_p4 }
   0xe   :  { %p230_p7 = pnand %p229_p6, %p223_p3 }
  0x10   :  { %233 = shalt.err (!%p230_p7)
}
  0x11   :  { %s285_s22 = smov 64   ;;  %s286_s23 = smov 4  }
  0x12   :  { %22 = dma.hbm_to_vmem [thread:$0]  %s361_s0, 256, %s17_s13, [#allocation3], %s285_s22, %s285_s22, %s286_s23  }
  0x13   :  { %s287_s26 = smov [#allocation5]   ;;  %s234_s30 = scalar_lea.hbm %s362_s1, 256 }
  0x14   :  { %s28_s27 = sshll.u32 %s287_s26, 4  ;;  %p235_p8 = scmp.ne.s32.totalorder %s362_s1, %s234_s30  ;;  %s29_s27 = int_to_ptr.vmem [resolvable:$true] %s28_s27 }
  0x15   :  { %p238_p9 = scmp.lt.u32.totalorder %s234_s30, %s362_s1 }
  0x17   :  { %p240_p10 = pnand %p238_p9, %p235_p8 }
  0x19   :  { %243 = shalt.err (!%p240_p10)
}
  0x1a   :  { %s244_s8 = scalar_lea.vmem %s29_s27, 256  ;;  %p249_p12 = scmp.lt.s32.totalorder %s29_s27, %s29_s27 }
  0x1b   :  { %p245_p11 = scmp.ne.s32.totalorder %s29_s27, %s244_s8  ;;  %p250_p13 = scmp.lt.s32.totalorder %s244_s8, %s244_s8 }
  0x1d   :  { %p251_p0 = por %p250_p13, %p249_p12 }
  0x1f   :  { %p252_p1 = pnand %p251_p0, %p245_p11 }
  0x21   :  { %255 = shalt.err (!%p252_p1)
}
  0x22   :  { %34 = dma.hbm_to_vmem [thread:$0]  %s362_s1, 256, %s29_s27, [#allocation6], %s285_s22, %s285_s22, %s286_s23  }
  0x23   :  { %278 = dma.done.wait [#allocation3], 256  }
  0x24   :  { %279 = vsyncadd [#allocation3], 4294967040 }
  0x25   :  { %280 = dma.done.wait [#allocation6], 256  }
  0x26   :  { %281 = vsyncadd [#allocation6], 4294967040  ;;  %v208_v0 = vld [vmem:[#allocation5] sm:$0xff]   ;;  %v209_v1 = vld [vmem:[#allocation5 + $0x8] sm:$0xff]   ;;  %vm81_vm0 = vcmask 261120   ;;  %vm153_vm1 = vcmask 781312  }
  0x27   :  { %195 = vmatprep.subr.bf16.mxu0 %v208_v0  ;;  %v210_v2 = vld [vmem:[#allocation2] sm:$0xff]   ;;  %v211_v3 = vld [vmem:[#allocation2 + $0x8] sm:$0xff]   ;;  %s288_s1 = smov [#allocation7]  }
  0x28   :  { %196 = vmatpush3.bf16.msra.mxu0 %v208_v0  ;;  %199 = vmatprep.mubr.msk.bf16.mxu0 %vm81_vm0, %v210_v2  ;;  %v176_v4 = vld [vmem:[%s363_s2] ss:$0 sm:$0xff]  ;;  %s163_s12 = sshll.u32 %s288_s1, 4  ;;  %s164_s12 = int_to_ptr.vmem [resolvable:$true] %s163_s12 }
  0x29   :  { %197 = vmatprep.subr.bf16.mxu0 %v209_v1  ;;  %s256_s2 = scalar_lea.vmem %s164_s12, 256  ;;  %p261_p3 = scmp.lt.s32.totalorder %s164_s12, %s164_s12 }
  0x2a   :  { %p257_p2 = scmp.ne.s32.totalorder %s164_s12, %s256_s2  ;;  %p262_p4 = scmp.lt.s32.totalorder %s256_s2, %s256_s2 }
  0x2c   :  { %198 = vmatpush3.bf16.msra.mxu0 %v209_v1  ;;  %p263_p5 = por %p262_p4, %p261_p3 }
  0x2e   :  { %p264_p6 = pnand %p263_p5, %p257_p2 }
  0x2f   :  { %200 = vmatmul.mubr.msk.bf16.vlgmr.msra.gmra.mrb[0].mxu0 %vm81_vm0, %v211_v3 }
 0x102   :  { %v201_v5 = vpop.f32.mrb[0].mxu0 }
 0x103   :  { %v131_v6 = vadd.f32 %v201_v5, %v176_v4  ;;  %v122_v7 = vpop.f32.mrb[1].mxu0 }
 0x104   :  { %v123_v8 = vadd.f32 %v176_v4, %v122_v7  ;;  %v202_v9 = vpop.f32.mrb[2].mxu0 }
 0x105   :  { %v189_v10 = vpack.c.bf16 %v131_v6, %v131_v6  ;;  %v134_v11 = vadd.f32 %v202_v9, %v176_v4  ;;  %v125_v12 = vpop.f32.mrb[3].mxu0 }
 0x106   :  { %v187_v13 = vpack.c.bf16 %v123_v8, %v123_v8  ;;  %v126_v14 = vadd.f32 %v176_v4, %v125_v12 }
 0x107   :  { %156 = vst.msk [vmem:[#allocation7 + $0x8] sm:$0xf] %vm153_vm1, %v189_v10  ;;  %v190_v15 = vpack.c.bf16 %v134_v11, %v134_v11 }
 0x108   :  { %154 = vst.msk [vmem:[#allocation7] sm:$0xf] %vm153_vm1, %v187_v13  ;;  %v188_v16 = vpack.c.bf16 %v126_v14, %v126_v14 }
 0x109   :  { %157 = vst.msk [vmem:[#allocation7 + $0xc] sm:$0xf] %vm153_vm1, %v190_v15 }
 0x10a   :  { %155 = vst.msk [vmem:[#allocation7 + $0x4] sm:$0xf] %vm153_vm1, %v188_v16 }
 0x10b   :  { %267 = shalt.err (!%p264_p6)
}
 0x10c   :  { %s268_s15 = scalar_lea.hbm %s364_s3, 256 }
 0x10d   :  { %p269_p7 = scmp.ne.s32.totalorder %s364_s3, %s268_s15  ;;  %p272_p8 = scmp.lt.u32.totalorder %s268_s15, %s364_s3 }
 0x10f   :  { %p274_p9 = pnand %p272_p8, %p269_p7 }
 0x111   :  { %277 = shalt.err (!%p274_p9)
}
 0x112   :  { %169 = dma.vmem_to_hbm [thread:$0]  %s164_s12, 256, %s364_s3, [#allocation4], %s285_s22, %s285_s22, %s286_s23  }
 0x113   :  { %282 = dma.done.wait [#allocation4], 256  }
 0x114   :  { %283 = vsyncadd [#allocation4], 4294967040 }
 0x115   :  { %173 = vsyncpa [#allocation3], 1 }
 0x116   :  { %174 = vsyncpa [#allocation6], 1 }
 0x117   :  { %175 = vsyncpa [#allocation4], 1 }

</bundles_post_ra>
